<compile_context>
chip_gen: v6e
topology: v6e:2x2x1
jax: 0.10.0
libtpu: 0.0.40
codegen_flags: <defaults>
</compile_context>

<pallas_src>
import math

import jax
import jax.numpy as jnp
import numpy as np
from jax.experimental import pallas as pl
from jax.experimental.pallas import tpu as pltpu  # noqa: F401  (no grid/pipelining or TPU-specific params needed for the collapsed kernel)

DIM = 32
HEADS = 4
HEAD_DIM = DIM // HEADS
FF_DIM = 4 * DIM
EPS = 1e-5


def _layernorm(v, w, b):
    mu = jnp.mean(v, axis=-1, keepdims=True)
    var = jnp.mean((v - mu) ** 2, axis=-1, keepdims=True)
    return (v - mu) * jax.lax.rsqrt(var + EPS) * w + b


def _gelu_exact(h):
    # nn.GELU() default (approximate='none'): 0.5*x*(1+erf(x/sqrt(2)))
    return 0.5 * h * (1.0 + jax.lax.erf(h / math.sqrt(2.0)))


def _build_kernel(bsz, seq):
    """Single-invocation kernel over the flattened (B*S, D) activations."""
    D, H, Hd = DIM, HEADS, HEAD_DIM
    BS = bsz * seq

    def xblock_kernel(x_ref, wqkv_ref, wo_ref, w1_ref, w2_ref, vecs_ref, o_ref):
        x = x_ref[...]                                   # (B*S, D) f32

        # Small vectors, packed lane-dense into one (8, 128) f32 tile on the host.
        vecs = vecs_ref[...]
        ln1_w = vecs[0, :D]
        ln1_b = vecs[1, :D]
        ln2_w = vecs[2, :D]
        ln2_b = vecs[3, :D]
        bo    = vecs[4, :D]
        b2    = vecs[5, :D]
        bqkv  = vecs[6, :3 * D]                          # q rows already pre-scaled by 1/sqrt(Hd)
        b1    = vecs[7, :FF_DIM]

        # ---- self attention (pre-norm) -----------------------------------
        n1 = _layernorm(x, ln1_w, ln1_b)                 # (B*S, D)
        # bf16 operands, f32 accumulation (weights pre-cast on the host).
        qkv = jnp.dot(n1.astype(jnp.bfloat16), wqkv_ref[...],
                      preferred_element_type=jnp.float32) + bqkv        # (B*S, 3D) f32
        q = qkv[:, :D]
        k = qkv[:, D:2 * D]
        v = qkv[:, 2 * D:]

        # Fold batch into the attention batch axis: (B*S, D) -> (H*B, S, Hd), index n = h*B + b.
        # The (B*S, Hd) -> (B, S, Hd) reshape is aligned to the 8-sublane tile (S == 8), so it is
        # layout-preserving; heads are folded with one leading-axis concat (no per-(b,h) stack).
        def to_heads(t):
            return jnp.concatenate(
                [t[:, h * Hd:(h + 1) * Hd].reshape(bsz, seq, Hd) for h in range(H)],
                axis=0)                                   # (H*B, S, Hd)

        qh = to_heads(q)
        kh = to_heads(k)
        vh = to_heads(v)

        # One fused softmax over all (batch, head) pairs; scores/probs stay f32.
        s = jnp.einsum('nqd,nkd->nqk', qh, kh,
                       preferred_element_type=jnp.float32)              # (H*B, S, S)
        s = s - jnp.max(s, axis=-1, keepdims=True)
        p = jnp.exp(s)
        # EUP approximate reciprocal + multiply instead of a VALU divide.
        p = p * pl.reciprocal(jnp.sum(p, axis=-1, keepdims=True), approx=True)
        oh = jnp.einsum('nqk,nkd->nqd', p, vh,
                        preferred_element_type=jnp.float32)             # (H*B, S, Hd)

        # Back to (B*S, D): leading-axis slices + tile-aligned merges, one lane-concat.
        attn = jnp.concatenate(
            [oh[h * bsz:(h + 1) * bsz].reshape(BS, Hd) for h in range(H)],
            axis=1)                                                      # (B*S, D)
        attn_out = jnp.dot(attn.astype(jnp.bfloat16), wo_ref[...],
                           preferred_element_type=jnp.float32) + bo
        x1 = x + attn_out                                                # residual 1

        # ---- feed-forward (pre-norm) --------------------------------------
        n2 = _layernorm(x1, ln2_w, ln2_b)
        hff = jnp.dot(n2.astype(jnp.bfloat16), w1_ref[...],
                      preferred_element_type=jnp.float32) + b1           # (B*S, 4D)
        g = _gelu_exact(hff)
        y = jnp.dot(g.astype(jnp.bfloat16), w2_ref[...],
                    preferred_element_type=jnp.float32) + b2             # (B*S, D)

        o_ref[...] = x1 + y                                              # residual 2

    return xblock_kernel


def prepare_params(params):
    """ONE-TIME host-side prep (hoisted out of the per-call path per the perf review):
    transpose weights, fold the 1/sqrt(head_dim) softmax scale into Q, cast weights to bf16,
    and pack all small vectors into a single lane-dense (8, 128) f32 tile."""
    D = DIM
    scale = 1.0 / math.sqrt(HEAD_DIM)

    wqkv = params["wqkv"].at[:D].multiply(scale)     # (3D, D), torch convention; scale q rows
    bqkv = params["bqkv"][0].at[:D].multiply(scale)  # (3D,)

    wqkv_t = wqkv.T.astype(jnp.bfloat16)             # (D, 3D)
    wo_t   = params["wo"].T.astype(jnp.bfloat16)     # (D, D)
    w1_t   = params["w1"].T.astype(jnp.bfloat16)     # (D, 4D)
    w2_t   = params["w2"].T.astype(jnp.bfloat16)     # (4D, D)

    vecs = jnp.zeros((8, 128), jnp.float32)
    vecs = vecs.at[0, :D].set(params["ln1_w"][0])
    vecs = vecs.at[1, :D].set(params["ln1_b"][0])
    vecs = vecs.at[2, :D].set(params["ln2_w"][0])
    vecs = vecs.at[3, :D].set(params["ln2_b"][0])
    vecs = vecs.at[4, :D].set(params["bo"][0])
    vecs = vecs.at[5, :D].set(params["b2"][0])
    vecs = vecs.at[6, :3 * D].set(bqkv)
    vecs = vecs.at[7, :FF_DIM].set(params["b1"][0])
    return wqkv_t, wo_t, w1_t, w2_t, vecs


@jax.jit
def xtransformer_block(x, wqkv_t, wo_t, w1_t, w2_t, vecs):
    """Jitted forward: flatten batch on the host (free relabel), one pallas_call, unflatten."""
    B, S, D = x.shape
    x2 = x.reshape(B * S, D)
    out2 = pl.pallas_call(
        _build_kernel(B, S),
        out_shape=jax.ShapeDtypeStruct((B * S, D), jnp.float32),
        # No grid: every operand is a single whole-array VMEM block (one DMA each,
        # no double-buffering of the constant weights, zero per-step pipeline overhead).
    )(x2, wqkv_t, wo_t, w1_t, w2_t, vecs)
    return out2.reshape(B, S, D)


def reference(x, params):
    """Pure-JAX f32 reference of the same forward (eval mode)."""
    def ln(v, w, b):
        mu = jnp.mean(v, axis=-1, keepdims=True)
        var = jnp.mean((v - mu) ** 2, axis=-1, keepdims=True)
        return (v - mu) * jax.lax.rsqrt(var + EPS) * w + b

    B, S, D = x.shape
    n1 = ln(x, params["ln1_w"][0], params["ln1_b"][0])
    qkv = jnp.einsum("bsd,ed->bse", n1, params["wqkv"]) + params["bqkv"][0]
    q, k, v = qkv[..., :D], qkv[..., D:2 * D], qkv[..., 2 * D:]
    q = q.reshape(B, S, HEADS, HEAD_DIM).transpose(0, 2, 1, 3)
    k = k.reshape(B, S, HEADS, HEAD_DIM).transpose(0, 2, 1, 3)
    v = v.reshape(B, S, HEADS, HEAD_DIM).transpose(0, 2, 1, 3)
    s = jnp.einsum("bhqd,bhkd->bhqk", q, k) / math.sqrt(HEAD_DIM)
    p = jax.nn.softmax(s, axis=-1)
    a = jnp.einsum("bhqk,bhkd->bhqd", p, v).transpose(0, 2, 1, 3).reshape(B, S, D)
    a = jnp.einsum("bsd,ed->bse", a, params["wo"]) + params["bo"][0]
    x1 = x + a
    n2 = ln(x1, params["ln2_w"][0], params["ln2_b"][0])
    h = jnp.einsum("bsd,ed->bse", n2, params["w1"]) + params["b1"][0]
    g = 0.5 * h * (1.0 + jax.lax.erf(h / math.sqrt(2.0)))
    y = jnp.einsum("bsd,ed->bse", g, params["w2"]) + params["b2"][0]
    return x1 + y


def init_params(key, dim=DIM):
    ks = jax.random.split(key, 8)
    s = 0.05
    return {
        "ln1_w": jnp.ones((1, dim), jnp.float32),
        "ln1_b": jnp.zeros((1, dim), jnp.float32),
        "wqkv": s * jax.random.normal(ks[0], (3 * dim, dim), jnp.float32),
        "bqkv": s * jax.random.normal(ks[1], (1, 3 * dim), jnp.float32),
        "wo":   s * jax.random.normal(ks[2], (dim, dim), jnp.float32),
        "bo":   s * jax.random.normal(ks[3], (1, dim), jnp.float32),
        "ln2_w": jnp.ones((1, dim), jnp.float32),
        "ln2_b": jnp.zeros((1, dim), jnp.float32),
        "w1":   s * jax.random.normal(ks[4], (4 * dim, dim), jnp.float32),
        "b1":   s * jax.random.normal(ks[5], (1, 4 * dim), jnp.float32),
        "w2":   s * jax.random.normal(ks[6], (dim, 4 * dim), jnp.float32),
        "b2":   s * jax.random.normal(ks[7], (1, dim), jnp.float32),
    }


if __name__ == "__main__":
    key = jax.random.PRNGKey(0)
    kx, kp = jax.random.split(key)
    B, S, D = 2, 8, DIM
    x = jax.random.normal(kx, (B, S, D), jnp.float32)
    params = init_params(kp, D)

    # One-time param prep (hoisted out of the forward path).
    prepared = jax.block_until_ready(prepare_params(params))

    out = jax.block_until_ready(xtransformer_block(x, *prepared))
    ref = jax.block_until_ready(reference(x, params))

    # Tolerance accommodates bf16 MXU operands (f32 accumulation) on the four projection
    # matmuls plus the EUP approximate reciprocal in the softmax; structural bugs would
    # produce errors orders of magnitude larger.
    np.testing.assert_allclose(np.asarray(out), np.asarray(ref), rtol=1e-2, atol=1e-2)
    print("KERNEL_OK")
</pallas_src>

<mosaic_0001>
module attributes {stable_mosaic.version = 11 : i64} {
  func.func @xblock_kernel(%arg0: memref<16x32xf32, #tpu.memory_space<vmem>>, %arg1: memref<32x96xbf16, #tpu.memory_space<vmem>>, %arg2: memref<32x32xbf16, #tpu.memory_space<vmem>>, %arg3: memref<32x128xbf16, #tpu.memory_space<vmem>>, %arg4: memref<128x32xbf16, #tpu.memory_space<vmem>>, %arg5: memref<8x128xf32, #tpu.memory_space<vmem>>, %arg6: memref<16x32xf32, #tpu.memory_space<vmem>>) attributes {dimension_semantics = [], scalar_prefetch = 0 : i64, scratch_operands = 0 : i64, tpu.core_type = #tpu.core_type<tc>} {
    %c0 = arith.constant 0 : index
    %c0_0 = arith.constant 0 : index
    %0 = vector.load %arg0[%c0, %c0_0] : memref<16x32xf32, #tpu.memory_space<vmem>>, vector<16x32xf32>
    %c0_1 = arith.constant 0 : index
    %c0_2 = arith.constant 0 : index
    %1 = vector.load %arg5[%c0_1, %c0_2] : memref<8x128xf32, #tpu.memory_space<vmem>>, vector<8x128xf32>
    %2 = vector.extract_strided_slice %1 {offsets = [0, 0], sizes = [1, 32], strides = [1, 1]} : vector<8x128xf32> to vector<1x32xf32>
    %3 = vector.shape_cast %2 : vector<1x32xf32> to vector<32xf32>
    %4 = vector.extract_strided_slice %1 {offsets = [1, 0], sizes = [1, 32], strides = [1, 1]} : vector<8x128xf32> to vector<1x32xf32>
    %5 = vector.shape_cast %4 : vector<1x32xf32> to vector<32xf32>
    %6 = vector.extract_strided_slice %1 {offsets = [2, 0], sizes = [1, 32], strides = [1, 1]} : vector<8x128xf32> to vector<1x32xf32>
    %7 = vector.shape_cast %6 : vector<1x32xf32> to vector<32xf32>
    %8 = vector.extract_strided_slice %1 {offsets = [3, 0], sizes = [1, 32], strides = [1, 1]} : vector<8x128xf32> to vector<1x32xf32>
    %9 = vector.shape_cast %8 : vector<1x32xf32> to vector<32xf32>
    %10 = vector.extract_strided_slice %1 {offsets = [4, 0], sizes = [1, 32], strides = [1, 1]} : vector<8x128xf32> to vector<1x32xf32>
    %11 = vector.shape_cast %10 : vector<1x32xf32> to vector<32xf32>
    %12 = vector.extract_strided_slice %1 {offsets = [5, 0], sizes = [1, 32], strides = [1, 1]} : vector<8x128xf32> to vector<1x32xf32>
    %13 = vector.shape_cast %12 : vector<1x32xf32> to vector<32xf32>
    %14 = vector.extract_strided_slice %1 {offsets = [6, 0], sizes = [1, 96], strides = [1, 1]} : vector<8x128xf32> to vector<1x96xf32>
    %15 = vector.shape_cast %14 : vector<1x96xf32> to vector<96xf32>
    %16 = vector.extract_strided_slice %1 {offsets = [7, 0], sizes = [1, 128], strides = [1, 1]} : vector<8x128xf32> to vector<1x128xf32>
    %17 = vector.shape_cast %16 : vector<1x128xf32> to vector<128xf32>
    %cst = arith.constant dense<0.000000e+00> : vector<16xf32>
    %18 = vector.multi_reduction <add>, %0, %cst [1] : vector<16x32xf32> to vector<16xf32>
    %19 = vector.shape_cast %18 : vector<16xf32> to vector<16x1xf32>
    %cst_3 = arith.constant 3.200000e+01 : f32
    %20 = vector.broadcast %cst_3 : f32 to vector<16x1xf32>
    %21 = arith.divf %19, %20 : vector<16x1xf32>
    %22 = vector.broadcast %21 : vector<16x1xf32> to vector<16x32xf32>
    %23 = arith.subf %0, %22 : vector<16x32xf32>
    %24 = arith.mulf %23, %23 : vector<16x32xf32>
    %cst_4 = arith.constant dense<0.000000e+00> : vector<16xf32>
    %25 = vector.multi_reduction <add>, %24, %cst_4 [1] : vector<16x32xf32> to vector<16xf32>
    %26 = vector.shape_cast %25 : vector<16xf32> to vector<16x1xf32>
    %cst_5 = arith.constant 3.200000e+01 : f32
    %27 = vector.broadcast %cst_5 : f32 to vector<16x1xf32>
    %28 = arith.divf %26, %27 : vector<16x1xf32>
    %29 = vector.broadcast %21 : vector<16x1xf32> to vector<16x32xf32>
    %30 = arith.subf %0, %29 : vector<16x32xf32>
    %cst_6 = arith.constant 9.99999974E-6 : f32
    %31 = vector.broadcast %cst_6 : f32 to vector<16x1xf32>
    %32 = arith.addf %28, %31 : vector<16x1xf32>
    %33 = math.rsqrt %32 : vector<16x1xf32>
    %34 = vector.broadcast %33 : vector<16x1xf32> to vector<16x32xf32>
    %35 = arith.mulf %30, %34 : vector<16x32xf32>
    %36 = vector.shape_cast %3 : vector<32xf32> to vector<1x32xf32>
    %37 = vector.broadcast %36 : vector<1x32xf32> to vector<16x32xf32>
    %38 = arith.mulf %35, %37 : vector<16x32xf32>
    %39 = vector.shape_cast %5 : vector<32xf32> to vector<1x32xf32>
    %40 = vector.broadcast %39 : vector<1x32xf32> to vector<16x32xf32>
    %41 = arith.addf %38, %40 : vector<16x32xf32>
    %42 = arith.truncf %41 : vector<16x32xf32> to vector<16x32xbf16>
    %c0_7 = arith.constant 0 : index
    %c0_8 = arith.constant 0 : index
    %43 = vector.load %arg1[%c0_7, %c0_8] : memref<32x96xbf16, #tpu.memory_space<vmem>>, vector<32x96xbf16>
    %cst_9 = arith.constant dense<0.000000e+00> : vector<16x96xf32>
    %44 = tpu.matmul %42, %43, %cst_9 {dimension_numbers = #tpu.dot_dimension_numbers<[1], [0], [0], [1], [0, 0, 1, 1], [], []>} : vector<16x32xbf16>, vector<32x96xbf16>, vector<16x96xf32> -> vector<16x96xf32>
    %45 = vector.shape_cast %15 : vector<96xf32> to vector<1x96xf32>
    %46 = vector.broadcast %45 : vector<1x96xf32> to vector<16x96xf32>
    %47 = arith.addf %44, %46 : vector<16x96xf32>
    %48 = vector.extract_strided_slice %47 {offsets = [0, 0], sizes = [16, 32], strides = [1, 1]} : vector<16x96xf32> to vector<16x32xf32>
    %49 = vector.extract_strided_slice %47 {offsets = [0, 32], sizes = [16, 32], strides = [1, 1]} : vector<16x96xf32> to vector<16x32xf32>
    %50 = vector.extract_strided_slice %47 {offsets = [0, 64], sizes = [16, 32], strides = [1, 1]} : vector<16x96xf32> to vector<16x32xf32>
    %51 = vector.extract_strided_slice %48 {offsets = [0, 0], sizes = [16, 8], strides = [1, 1]} : vector<16x32xf32> to vector<16x8xf32>
    %52 = vector.shape_cast %51 : vector<16x8xf32> to vector<2x8x8xf32>
    %53 = vector.extract_strided_slice %48 {offsets = [0, 8], sizes = [16, 8], strides = [1, 1]} : vector<16x32xf32> to vector<16x8xf32>
    %54 = vector.shape_cast %53 : vector<16x8xf32> to vector<2x8x8xf32>
    %55 = vector.extract_strided_slice %48 {offsets = [0, 16], sizes = [16, 8], strides = [1, 1]} : vector<16x32xf32> to vector<16x8xf32>
    %56 = vector.shape_cast %55 : vector<16x8xf32> to vector<2x8x8xf32>
    %57 = vector.extract_strided_slice %48 {offsets = [0, 24], sizes = [16, 8], strides = [1, 1]} : vector<16x32xf32> to vector<16x8xf32>
    %58 = vector.shape_cast %57 : vector<16x8xf32> to vector<2x8x8xf32>
    %59 = tpu.concatenate %52, %54, %56, %58 in 0 : vector<2x8x8xf32>, vector<2x8x8xf32>, vector<2x8x8xf32>, vector<2x8x8xf32> -> vector<8x8x8xf32>
    %60 = vector.extract_strided_slice %49 {offsets = [0, 0], sizes = [16, 8], strides = [1, 1]} : vector<16x32xf32> to vector<16x8xf32>
    %61 = vector.shape_cast %60 : vector<16x8xf32> to vector<2x8x8xf32>
    %62 = vector.extract_strided_slice %49 {offsets = [0, 8], sizes = [16, 8], strides = [1, 1]} : vector<16x32xf32> to vector<16x8xf32>
    %63 = vector.shape_cast %62 : vector<16x8xf32> to vector<2x8x8xf32>
    %64 = vector.extract_strided_slice %49 {offsets = [0, 16], sizes = [16, 8], strides = [1, 1]} : vector<16x32xf32> to vector<16x8xf32>
    %65 = vector.shape_cast %64 : vector<16x8xf32> to vector<2x8x8xf32>
    %66 = vector.extract_strided_slice %49 {offsets = [0, 24], sizes = [16, 8], strides = [1, 1]} : vector<16x32xf32> to vector<16x8xf32>
    %67 = vector.shape_cast %66 : vector<16x8xf32> to vector<2x8x8xf32>
    %68 = tpu.concatenate %61, %63, %65, %67 in 0 : vector<2x8x8xf32>, vector<2x8x8xf32>, vector<2x8x8xf32>, vector<2x8x8xf32> -> vector<8x8x8xf32>
    %69 = vector.extract_strided_slice %50 {offsets = [0, 0], sizes = [16, 8], strides = [1, 1]} : vector<16x32xf32> to vector<16x8xf32>
    %70 = vector.shape_cast %69 : vector<16x8xf32> to vector<2x8x8xf32>
    %71 = vector.extract_strided_slice %50 {offsets = [0, 8], sizes = [16, 8], strides = [1, 1]} : vector<16x32xf32> to vector<16x8xf32>
    %72 = vector.shape_cast %71 : vector<16x8xf32> to vector<2x8x8xf32>
    %73 = vector.extract_strided_slice %50 {offsets = [0, 16], sizes = [16, 8], strides = [1, 1]} : vector<16x32xf32> to vector<16x8xf32>
    %74 = vector.shape_cast %73 : vector<16x8xf32> to vector<2x8x8xf32>
    %75 = vector.extract_strided_slice %50 {offsets = [0, 24], sizes = [16, 8], strides = [1, 1]} : vector<16x32xf32> to vector<16x8xf32>
    %76 = vector.shape_cast %75 : vector<16x8xf32> to vector<2x8x8xf32>
    %77 = tpu.concatenate %70, %72, %74, %76 in 0 : vector<2x8x8xf32>, vector<2x8x8xf32>, vector<2x8x8xf32>, vector<2x8x8xf32> -> vector<8x8x8xf32>
    "tpu.trace_start"() <{level = 10 : i32, message = "nqd,nkd->nqk"}> : () -> ()
    %cst_10 = arith.constant dense<0.000000e+00> : vector<8x8x8xf32>
    %78 = tpu.matmul %59, %68, %cst_10 {dimension_numbers = #tpu.dot_dimension_numbers<[2], [2], [1], [1], [0, 0, 0, 1, 1, 1], [0], [0]>} : vector<8x8x8xf32>, vector<8x8x8xf32>, vector<8x8x8xf32> -> vector<8x8x8xf32>
    "tpu.trace_stop"() : () -> ()
    %cst_11 = arith.constant dense<0xFF800000> : vector<8x8xf32>
    %79 = vector.multi_reduction <maximumf>, %78, %cst_11 [2] : vector<8x8x8xf32> to vector<8x8xf32>
    %80 = vector.shape_cast %79 : vector<8x8xf32> to vector<8x8x1xf32>
    %81 = vector.broadcast %80 : vector<8x8x1xf32> to vector<8x8x8xf32>
    %82 = arith.subf %78, %81 : vector<8x8x8xf32>
    %83 = math.exp %82 : vector<8x8x8xf32>
    %cst_12 = arith.constant dense<0.000000e+00> : vector<8x8xf32>
    %84 = vector.multi_reduction <add>, %83, %cst_12 [2] : vector<8x8x8xf32> to vector<8x8xf32>
    %85 = vector.shape_cast %84 : vector<8x8xf32> to vector<8x8x1xf32>
    %86 = tpu.reciprocal %85 {approx = true} : vector<8x8x1xf32> -> vector<8x8x1xf32>
    %87 = vector.broadcast %86 : vector<8x8x1xf32> to vector<8x8x8xf32>
    %88 = arith.mulf %83, %87 : vector<8x8x8xf32>
    "tpu.trace_start"() <{level = 10 : i32, message = "nqk,nkd->nqd"}> : () -> ()
    %cst_13 = arith.constant dense<0.000000e+00> : vector<8x8x8xf32>
    %89 = tpu.matmul %88, %77, %cst_13 {dimension_numbers = #tpu.dot_dimension_numbers<[2], [1], [1], [2], [0, 0, 0, 1, 1, 2], [0], [0]>} : vector<8x8x8xf32>, vector<8x8x8xf32>, vector<8x8x8xf32> -> vector<8x8x8xf32>
    "tpu.trace_stop"() : () -> ()
    %90 = vector.extract_strided_slice %89 {offsets = [0, 0, 0], sizes = [2, 8, 8], strides = [1, 1, 1]} : vector<8x8x8xf32> to vector<2x8x8xf32>
    %91 = vector.shape_cast %90 : vector<2x8x8xf32> to vector<16x8xf32>
    %92 = vector.extract_strided_slice %89 {offsets = [2, 0, 0], sizes = [2, 8, 8], strides = [1, 1, 1]} : vector<8x8x8xf32> to vector<2x8x8xf32>
    %93 = vector.shape_cast %92 : vector<2x8x8xf32> to vector<16x8xf32>
    %94 = vector.extract_strided_slice %89 {offsets = [4, 0, 0], sizes = [2, 8, 8], strides = [1, 1, 1]} : vector<8x8x8xf32> to vector<2x8x8xf32>
    %95 = vector.shape_cast %94 : vector<2x8x8xf32> to vector<16x8xf32>
    %96 = vector.extract_strided_slice %89 {offsets = [6, 0, 0], sizes = [2, 8, 8], strides = [1, 1, 1]} : vector<8x8x8xf32> to vector<2x8x8xf32>
    %97 = vector.shape_cast %96 : vector<2x8x8xf32> to vector<16x8xf32>
    %98 = tpu.concatenate %91, %93, %95, %97 in 1 : vector<16x8xf32>, vector<16x8xf32>, vector<16x8xf32>, vector<16x8xf32> -> vector<16x32xf32>
    %99 = arith.truncf %98 : vector<16x32xf32> to vector<16x32xbf16>
    %c0_14 = arith.constant 0 : index
    %c0_15 = arith.constant 0 : index
    %100 = vector.load %arg2[%c0_14, %c0_15] : memref<32x32xbf16, #tpu.memory_space<vmem>>, vector<32x32xbf16>
    %cst_16 = arith.constant dense<0.000000e+00> : vector<16x32xf32>
    %101 = tpu.matmul %99, %100, %cst_16 {dimension_numbers = #tpu.dot_dimension_numbers<[1], [0], [0], [1], [0, 0, 1, 1], [], []>} : vector<16x32xbf16>, vector<32x32xbf16>, vector<16x32xf32> -> vector<16x32xf32>
    %102 = vector.shape_cast %11 : vector<32xf32> to vector<1x32xf32>
    %103 = vector.broadcast %102 : vector<1x32xf32> to vector<16x32xf32>
    %104 = arith.addf %101, %103 : vector<16x32xf32>
    %105 = arith.addf %0, %104 : vector<16x32xf32>
    %cst_17 = arith.constant dense<0.000000e+00> : vector<16xf32>
    %106 = vector.multi_reduction <add>, %105, %cst_17 [1] : vector<16x32xf32> to vector<16xf32>
    %107 = vector.shape_cast %106 : vector<16xf32> to vector<16x1xf32>
    %cst_18 = arith.constant 3.200000e+01 : f32
    %108 = vector.broadcast %cst_18 : f32 to vector<16x1xf32>
    %109 = arith.divf %107, %108 : vector<16x1xf32>
    %110 = vector.broadcast %109 : vector<16x1xf32> to vector<16x32xf32>
    %111 = arith.subf %105, %110 : vector<16x32xf32>
    %112 = arith.mulf %111, %111 : vector<16x32xf32>
    %cst_19 = arith.constant dense<0.000000e+00> : vector<16xf32>
    %113 = vector.multi_reduction <add>, %112, %cst_19 [1] : vector<16x32xf32> to vector<16xf32>
    %114 = vector.shape_cast %113 : vector<16xf32> to vector<16x1xf32>
    %cst_20 = arith.constant 3.200000e+01 : f32
    %115 = vector.broadcast %cst_20 : f32 to vector<16x1xf32>
    %116 = arith.divf %114, %115 : vector<16x1xf32>
    %117 = vector.broadcast %109 : vector<16x1xf32> to vector<16x32xf32>
    %118 = arith.subf %105, %117 : vector<16x32xf32>
    %cst_21 = arith.constant 9.99999974E-6 : f32
    %119 = vector.broadcast %cst_21 : f32 to vector<16x1xf32>
    %120 = arith.addf %116, %119 : vector<16x1xf32>
    %121 = math.rsqrt %120 : vector<16x1xf32>
    %122 = vector.broadcast %121 : vector<16x1xf32> to vector<16x32xf32>
    %123 = arith.mulf %118, %122 : vector<16x32xf32>
    %124 = vector.shape_cast %7 : vector<32xf32> to vector<1x32xf32>
    %125 = vector.broadcast %124 : vector<1x32xf32> to vector<16x32xf32>
    %126 = arith.mulf %123, %125 : vector<16x32xf32>
    %127 = vector.shape_cast %9 : vector<32xf32> to vector<1x32xf32>
    %128 = vector.broadcast %127 : vector<1x32xf32> to vector<16x32xf32>
    %129 = arith.addf %126, %128 : vector<16x32xf32>
    %130 = arith.truncf %129 : vector<16x32xf32> to vector<16x32xbf16>
    %c0_22 = arith.constant 0 : index
    %c0_23 = arith.constant 0 : index
    %131 = vector.load %arg3[%c0_22, %c0_23] : memref<32x128xbf16, #tpu.memory_space<vmem>>, vector<32x128xbf16>
    %cst_24 = arith.constant dense<0.000000e+00> : vector<16x128xf32>
    %132 = tpu.matmul %130, %131, %cst_24 {dimension_numbers = #tpu.dot_dimension_numbers<[1], [0], [0], [1], [0, 0, 1, 1], [], []>} : vector<16x32xbf16>, vector<32x128xbf16>, vector<16x128xf32> -> vector<16x128xf32>
    %133 = vector.shape_cast %17 : vector<128xf32> to vector<1x128xf32>
    %134 = vector.broadcast %133 : vector<1x128xf32> to vector<16x128xf32>
    %135 = arith.addf %132, %134 : vector<16x128xf32>
    %cst_25 = arith.constant 5.000000e-01 : f32
    %136 = vector.broadcast %cst_25 : f32 to vector<16x128xf32>
    %137 = arith.mulf %136, %135 : vector<16x128xf32>
    %cst_26 = arith.constant 1.41421354 : f32
    %138 = vector.broadcast %cst_26 : f32 to vector<16x128xf32>
    %139 = arith.divf %135, %138 : vector<16x128xf32>
    %140 = math.erf %139 : vector<16x128xf32>
    %cst_27 = arith.constant 1.000000e+00 : f32
    %141 = vector.broadcast %cst_27 : f32 to vector<16x128xf32>
    %142 = arith.addf %141, %140 : vector<16x128xf32>
    %143 = arith.mulf %137, %142 : vector<16x128xf32>
    %144 = arith.truncf %143 : vector<16x128xf32> to vector<16x128xbf16>
    %c0_28 = arith.constant 0 : index
    %c0_29 = arith.constant 0 : index
    %145 = vector.load %arg4[%c0_28, %c0_29] : memref<128x32xbf16, #tpu.memory_space<vmem>>, vector<128x32xbf16>
    %cst_30 = arith.constant dense<0.000000e+00> : vector<16x32xf32>
    %146 = tpu.matmul %144, %145, %cst_30 {dimension_numbers = #tpu.dot_dimension_numbers<[1], [0], [0], [1], [0, 0, 1, 1], [], []>} : vector<16x128xbf16>, vector<128x32xbf16>, vector<16x32xf32> -> vector<16x32xf32>
    %147 = vector.shape_cast %13 : vector<32xf32> to vector<1x32xf32>
    %148 = vector.broadcast %147 : vector<1x32xf32> to vector<16x32xf32>
    %149 = arith.addf %146, %148 : vector<16x32xf32>
    %150 = arith.addf %105, %149 : vector<16x32xf32>
    %c0_31 = arith.constant 0 : index
    %c0_32 = arith.constant 0 : index
    %151 = vector.load %arg6[%c0_31, %c0_32] : memref<16x32xf32, #tpu.memory_space<vmem>>, vector<16x32xf32>
    tpu.vector_store %arg6[%c0_31, %c0_32], %150 {strides = array<i32>} : memref<16x32xf32, #tpu.memory_space<vmem>>, vector<16x32xf32>,
    return
  }
}

</mosaic_0001>

<bundles_post_ra>
// kernel: xtransformer_block.1
= control target key start
LH: loop header
LB: loop body
LE: loop exit
PB: predicated region body
PF: predicated region fallthrough
CT: control target
= control target key end

     0   :  { %vm28_vm0 = vcmask 261120   ;;  %s2455_s0 = inlined_call_operand.vmem [shape: f32[16,32], index: 0, kind: input, shape index: {}]   ;;  %s2456_s1 = inlined_call_operand.vmem [shape: bf16[32,96], index: 1, kind: input, shape index: {}]   ;;  %s2457_s2 = inlined_call_operand.vmem [shape: bf16[32,32], index: 2, kind: input, shape index: {}]   ;;  %s2458_s3 = inlined_call_operand.vmem [shape: bf16[32,128], index: 3, kind: input, shape index: {}]   ;;  %s2459_s4 = inlined_call_operand.vmem [shape: bf16[128,32], index: 4, kind: input, shape index: {}]   ;;  %s2460_s5 = inlined_call_operand.vmem [shape: f32[8,128], index: 5, kind: input, shape index: {}]   ;;  %s2461_s6 = inlined_call_operand.hbm [shape: f32[16,32], index: 6, kind: output, shape index: {}]  }
   0x1   :  { %v2167_v0 = vld [vmem:[%s2455_s0] sm:$0xff]  ;;  %v2172_v1 = vld [vmem:[%s2455_s0 + $0x8] sm:$0xff] }
   0x2   :  { %v29_v2 = vsel %vm28_vm0, %v2167_v0, 0.0  ;;  %v32_v3 = vsel %vm28_vm0, %v2172_v1, 0.0 }
   0x3   :  { %30 = vadd.xlane.f32.xlu0 %v29_v2 }
   0x7   :  { %33 = vadd.xlane.f32.xlu0 %v32_v3 }
   0x8   :  { %11 = vsyncpa [#allocation3], 0  ;;  %v2037_v14 = vld [vmem:[%s2456_s1 + $0x8] sm:$0xff]   ;;  %v2117_v15 = vmov 0.0   ;;  %vm2118_vm1 = vmmov 0   ;;  %v2038_v16 = vld [vmem:[%s2456_s1] sm:$0xff]   ;;  %v56_v23 = vlaneseq }
   0x9   :  { %1886 = vmatprep.subr.bf16.mxu0 %v2117_v15  ;;  %1890 = vmatprep.mubr.msk.bf16.mxu0 %vm2118_vm1, %v2117_v15  ;;  %v2202_v26 = vld [vmem:[%s2460_s5] sm:$0xff]  ;;  %s2119_s5 = smov 112   ;;  %s2120_s29 = smov 120   ;;  %vm149_vm2 = vcmask 64512   ;;  %vm1478_vm3 = vcmask 130048   ;;  %vm1481_vm4 = vcmask 195584  }
   0xa   :  { %1887 = vmatpush3.bf16.msra.mxu0 %v2037_v14  ;;  %1899 = vmatprep.subr.mxu1 %v2117_v15  ;;  %v2196_v24 = vshrl.u32 %v56_v23, 7  ;;  %s2121_s30 = smov 104   ;;  %s2122_s7 = smov 96  }
   0xb   :  { %1888 = vmatprep.subr.bf16.mxu0 %v2117_v15  ;;  %1901 = vmatprep.mubr.msk.f32.mxu1 %vm2118_vm1, %v2117_v15  ;;  %s2123_s8 = smov 64   ;;  %s2124_s13 = smov 8  }
   0xc   :  { %v58_v25 = vsub.s32 0, %v2196_v24  ;;  %v64_v30 = vsub.s32 1, %v2196_v24  ;;  %v75_v39 = vsub.s32 6, %v2196_v24  ;;  %s2125_s14 = smov 16  }
   0xe   :  { %1889 = vmatpush3.bf16.msra.mxu0 %v2038_v16  ;;  %v59_v29 = vrot.slane %v2202_v26, %v58_v25  ;;  %v65_v34 = vrot.slane %v2202_v26, %v64_v30  ;;  %v76_v40 = vrot.slane %v2202_v26, %v75_v39 }
   0xf   :  { %1894 = vmatprep.subr.mxu0 %v2117_v15 }
  0x8c   :  { %v31_v4 = vpop.xlane.xlu0 %30 }
  0x8d   :  { %v36_v5 = vmul.f32 0.03125, %v31_v4 }
  0x8f   :  { %v38_v6 = vsub.f32 %v2167_v0, %v36_v5 }
  0x90   :  { %v34_v7 = vpop.xlane.xlu0 %33 }
  0x91   :  { %v37_v8 = vmul.f32 0.03125, %v34_v7  ;;  %v40_v9 = vmul.f32 %v38_v6, %v38_v6 }
  0x93   :  { %v39_v10 = vsub.f32 %v2172_v1, %v37_v8  ;;  %v42_v11 = vsel %vm28_vm0, %v40_v9, 0.0 }
  0x94   :  { %43 = vadd.xlane.f32.xlu1 %v42_v11 }
  0x95   :  { %v41_v12 = vmul.f32 %v39_v10, %v39_v10 }
  0x97   :  { %v45_v13 = vsel %vm28_vm0, %v41_v12, 0.0 }
  0x98   :  { %46 = vadd.xlane.f32.xlu1 %v45_v13 }
 0x11d   :  { %v44_v17 = vpop.xlane.xlu1 %43 }
 0x11e   :  { %v48_v18 = vmul.f32 0.03125, %v44_v17 }
 0x120   :  { %v50_v19 = vadd.f32 1e-05, %v48_v18 }
 0x121   :  { %v47_v20 = vpop.xlane.xlu1 %46 }
 0x122   :  { %2051 = vrsqrt.f32 %v50_v19  ;;  %v49_v21 = vmul.f32 0.03125, %v47_v20 }
 0x124   :  { %v51_v22 = vadd.f32 1e-05, %v49_v21 }
 0x126   :  { %2053 = vrsqrt.f32 %v51_v22 }
 0x12f   :  { %v2052_v27 = vpop.eup %2051 }
 0x130   :  { %v54_v28 = vmul.f32 %v2052_v27, %v38_v6 }
 0x132   :  { %v60_v33 = vmul.f32 %v59_v29, %v54_v28 }
 0x133   :  { %v2054_v31 = vpop.eup %2053 }
 0x134   :  { %v55_v32 = vmul.f32 %v2054_v31, %v39_v10  ;;  %v66_v36 = vadd.f32 %v65_v34, %v60_v33 }
 0x136   :  { %v61_v35 = vmul.f32 %v59_v29, %v55_v32 }
 0x138   :  { %v67_v37 = vadd.f32 %v65_v34, %v61_v35 }
 0x13a   :  { %v68_v38 = vpack.c.bf16 %v67_v37, %v66_v36 }
 0x13c   :  { %1891 = vmatmul.mubr.msk.bf16.vlgmr.msra.gmra.mxu0 %vm28_vm0, %v68_v38 }
 0x13d   :  { %1896 = vmatprep.mubr.msk.f32.mxu0 %vm2118_vm1, %v2117_v15 }
 0x1fc   :  { %v126_v41 = vpop.f32.mrf.mxu0 }
 0x1fd   :  { %v2212_v42 = vadd.f32 %v126_v41, %v76_v40 }
 0x1fe   :  { %v1892_v43 = vpop.f32.mrf.mxu0 }
 0x1ff   :  { %139 = vrot.lane.b32.xlu1 %v2212_v42, %s2119_s5  ;;  %135 = vrot.lane.b32.xlu0 %v2212_v42, %s2120_s29 }
 0x200   :  { %v129_v44 = vpop.f32.mrf.mxu0 }
 0x201   :  { %v2216_v45 = vadd.f32 %v129_v44, %v76_v40 }
 0x202   :  { %v1893_v46 = vpop.f32.mrf.mxu0 }
 0x203   :  { %143 = vrot.lane.b32.xlu0 %v2212_v42, %s2121_s30  ;;  %137 = vrot.lane.b32.xlu1 %v2216_v45, %s2120_s29 }
 0x207   :  { %147 = vrot.lane.b32.xlu0 %v2212_v42, %s2122_s7  ;;  %141 = vrot.lane.b32.xlu1 %v2216_v45, %s2119_s5 }
 0x20b   :  { %145 = vrot.lane.b32.xlu1 %v2216_v45, %s2121_s30 }
 0x20f   :  { %224 = vrot.lane.b32.xlu1 %v2216_v45, %s2122_s7 }
 0x271   :  { %v2224_v47 = vpop.permute.xlu1 %139  ;;  %v2226_v48 = vpop.permute.xlu0 %135 }
 0x272   :  { %300 = vrot.lane.b32.xlu0 %v2226_v48, %s2122_s7 }
 0x275   :  { %v2229_v49 = vpop.permute.xlu0 %143  ;;  %v2231_v50 = vpop.permute.xlu1 %137 }
 0x276   :  { %452 = vrot.lane.b32.xlu0 %v2224_v47, %s2122_s7  ;;  %376 = vrot.lane.b32.xlu1 %v2231_v50, %s2122_s7 }
 0x279   :  { %v148_v51 = vpop.permute.xlu0 %147  ;;  %v2235_v52 = vpop.permute.xlu1 %141 }
 0x27a   :  { %604 = vrot.lane.b32.xlu0 %v2229_v49, %s2122_s7  ;;  %1895 = vmatpush3.xpose.msk.msra.mxu0 %vm149_vm2, %v148_v51 }
 0x27b   :  { %528 = vrot.lane.b32.xlu1 %v2235_v52, %s2122_s7  ;;  %1909 = vmatprep.subr.mxu0 %v2117_v15 }
 0x27d   :  { %1897 = vmatmul.mubr.msk.f32.vlgmr.msra.gmra.mxu0 %vm149_vm2, %v2212_v42  ;;  %v2243_v53 = vpop.permute.xlu1 %145 }
 0x27e   :  { %1911 = vmatprep.mubr.msk.f32.mxu0 %vm2118_vm1, %v2117_v15 }
 0x27f   :  { %680 = vrot.lane.b32.xlu1 %v2243_v53, %s2122_s7 }
 0x281   :  { %v225_v54 = vpop.permute.xlu1 %224 }
 0x282   :  { %1900 = vmatpush3.xpose.msk.msra.mxu1 %vm149_vm2, %v225_v54 }
 0x283   :  { %1904 = vmatprep.subr.mxu1 %v2117_v15 }
 0x285   :  { %1902 = vmatmul.mubr.msk.f32.vlgmr.msra.gmra.mxu1 %vm149_vm2, %v2216_v45 }
 0x286   :  { %1906 = vmatprep.mubr.msk.f32.mxu1 %vm2118_vm1, %v2117_v15 }
 0x2e4   :  { %v301_v55 = vpop.permute.xlu0 %300 }
 0x2e5   :  { %1905 = vmatpush3.xpose.msk.msra.mxu1 %vm149_vm2, %v301_v55 }
 0x2e6   :  { %1914 = vmatprep.subr.mxu1 %v2117_v15 }
 0x2e8   :  { %v453_v56 = vpop.permute.xlu0 %452  ;;  %1907 = vmatmul.mubr.msk.f32.vlgmr.msra.gmra.mxu1 %vm149_vm2, %v2226_v48  ;;  %v377_v57 = vpop.permute.xlu1 %376 }
 0x2e9   :  { %1910 = vmatpush3.xpose.msk.msra.mxu0 %vm149_vm2, %v377_v57  ;;  %1915 = vmatpush3.xpose.msk.msra.mxu1 %vm149_vm2, %v453_v56 }
 0x2ea   :  { %1916 = vmatprep.mubr.msk.f32.mxu1 %vm2118_vm1, %v2117_v15  ;;  %1919 = vmatprep.subr.mxu0 %v2117_v15 }
 0x2eb   :  { %1924 = vmatprep.subr.mxu1 %v2117_v15 }
 0x2ec   :  { %v605_v58 = vpop.permute.xlu0 %604  ;;  %1912 = vmatmul.mubr.msk.f32.vlgmr.msra.gmra.mxu0 %vm149_vm2, %v2231_v50  ;;  %1917 = vmatmul.mubr.msk.f32.vlgmr.msra.gmra.mxu1 %vm149_vm2, %v2224_v47 }
 0x2ed   :  { %v529_v59 = vpop.permute.xlu1 %528  ;;  %1925 = vmatpush3.xpose.msk.msra.mxu1 %vm149_vm2, %v605_v58  ;;  %1921 = vmatprep.mubr.msk.f32.mxu0 %vm2118_vm1, %v2117_v15 }
 0x2ee   :  { %1920 = vmatpush3.xpose.msk.msra.mxu0 %vm149_vm2, %v529_v59  ;;  %1926 = vmatprep.mubr.msk.f32.mxu1 %vm2118_vm1, %v2117_v15 }
 0x2ef   :  { %1929 = vmatprep.subr.mxu0 %v2117_v15  ;;  %1934 = vmatprep.subr.mxu1 %v2117_v15 }
 0x2f0   :  { %1927 = vmatmul.mubr.msk.f32.vlgmr.msra.gmra.mxu1 %vm149_vm2, %v2229_v49 }
 0x2f1   :  { %1922 = vmatmul.mubr.msk.f32.vlgmr.msra.gmra.mxu0 %vm149_vm2, %v2235_v52  ;;  %v681_v60 = vpop.permute.xlu1 %680  ;;  %1936 = vmatprep.mubr.msk.f32.mxu1 %vm2118_vm1, %v2117_v15 }
 0x2f2   :  { %1930 = vmatpush3.xpose.msk.msra.mxu0 %vm149_vm2, %v681_v60  ;;  %1931 = vmatprep.mubr.msk.f32.mxu0 %vm2118_vm1, %v2117_v15 }
 0x2f3   :  { %1939 = vmatprep.subr.mxu0 %v2117_v15 }
 0x2f5   :  { %1932 = vmatmul.mubr.msk.f32.vlgmr.msra.gmra.mxu0 %vm149_vm2, %v2243_v53 }
 0x2f6   :  { %1941 = vmatprep.mubr.msk.f32.mxu0 %vm2118_vm1, %v2117_v15 }
 0x33d   :  { %v220_v61 = vpop.f32.mrf.mxu0 }
 0x33e   :  { %v756_v62 = vsel %vm149_vm2, %v220_v61, -inf }
 0x33f   :  { %757 = vmax.xlane.f32.xlu0 %v756_v62  ;;  %v1898_v63 = vpop.f32.mrf.mxu0 }
 0x345   :  { %v296_v2 = vpop.f32.mrf.mxu1 }
 0x346   :  { %v759_v3 = vsel %vm149_vm2, %v296_v2, -inf }
 0x347   :  { %760 = vmax.xlane.f32.xlu1 %v759_v3  ;;  %v1903_v4 = vpop.f32.mrf.mxu1 }
 0x3a8   :  { %v372_v5 = vpop.f32.mrf.mxu1 }
 0x3a9   :  { %v762_v6 = vsel %vm149_vm2, %v372_v5, -inf }
 0x3aa   :  { %v1908_v7 = vpop.f32.mrf.mxu1  ;;  %763 = vmax.xlane.f32.xlu0 %v762_v6 }
 0x3ac   :  { %v448_v8 = vpop.f32.mrf.mxu0  ;;  %v524_v9 = vpop.f32.mrf.mxu1 }
 0x3ad   :  { %v765_v10 = vsel %vm149_vm2, %v448_v8, -inf  ;;  %v768_v16 = vsel %vm149_vm2, %v524_v9, -inf }
 0x3ae   :  { %v1918_v11 = vpop.f32.mrf.mxu1  ;;  %766 = vmax.xlane.f32.xlu0 %v765_v10  ;;  %v1913_v12 = vpop.f32.mrf.mxu0 }
 0x3b0   :  { %v676_v13 = vpop.f32.mrf.mxu1 }
 0x3b1   :  { %v600_v14 = vpop.f32.mrf.mxu0  ;;  %v774_v21 = vsel %vm149_vm2, %v676_v13, -inf }
 0x3b2   :  { %v1928_v17 = vpop.f32.mrf.mxu1  ;;  %769 = vmax.xlane.f32.xlu0 %v768_v16  ;;  %v771_v18 = vsel %vm149_vm2, %v600_v14, -inf }
 0x3b3   :  { %772 = vmax.xlane.f32.xlu1 %v771_v18  ;;  %v1923_v19 = vpop.f32.mrf.mxu0 }
 0x3b5   :  { %v752_v20 = vpop.f32.mrf.mxu0 }
 0x3b6   :  { %775 = vmax.xlane.f32.xlu0 %v774_v21  ;;  %v777_v22 = vsel %vm149_vm2, %v752_v20, -inf }
 0x3b7   :  { %778 = vmax.xlane.f32.xlu1 %v777_v22  ;;  %v1933_v23 = vpop.f32.mrf.mxu0 }
 0x3c8   :  { %920 = vrot.lane.b32.xlu1 %v2216_v45, %s2123_s8  ;;  %v758_v25 = vpop.xlane.xlu0 %757 }
 0x3c9   :  { %v780_v27 = vsub.f32 %v220_v61, %v758_v25 }
 0x3cb   :  { %v788_v28 = vmul.f32 1.442695, %v780_v27 }
 0x3cc   :  { %996 = vrot.lane.b32.xlu1 %v2226_v48, %s2123_s8  ;;  %844 = vrot.lane.b32.xlu0 %v2212_v42, %s2123_s8 }
 0x3cd   :  { %2055 = vpow2.f32 %v788_v28 }
 0x3d0   :  { %1072 = vrot.lane.b32.xlu1 %v2231_v50, %s2123_s8  ;;  %1148 = vrot.lane.b32.xlu0 %v2224_v47, %s2123_s8  ;;  %v761_v29 = vpop.xlane.xlu1 %760 }
 0x3d1   :  { %v781_v30 = vsub.f32 %v296_v2, %v761_v29 }
 0x3d3   :  { %v790_v31 = vmul.f32 1.442695, %v781_v30 }
 0x3d4   :  { %1224 = vrot.lane.b32.xlu1 %v2235_v52, %s2123_s8 }
 0x3d5   :  { %2057 = vpow2.f32 %v790_v31 }
 0x3da   :  { %v2310_v32 = vpop.eup %2055 }
 0x3db   :  { %v804_v33 = vsel %vm149_vm2, %v2310_v32, 0.0 }
 0x3e2   :  { %v2314_v34 = vpop.eup %2057 }
 0x3e3   :  { %v807_v35 = vsel %vm149_vm2, %v2314_v34, 0.0 }
 0x3ef   :  { %805 = vadd.xlane.f32.xlu0 %v804_v33 }
 0x3f8   :  { %808 = vadd.xlane.f32.xlu1 %v807_v35 }
 0x433   :  { %v764_v36 = vpop.xlane.xlu0 %763 }
 0x434   :  { %v782_v37 = vsub.f32 %v372_v5, %v764_v36 }
 0x436   :  { %v792_v38 = vmul.f32 1.442695, %v782_v37 }
 0x437   :  { %v767_v39 = vpop.xlane.xlu0 %766 }
 0x438   :  { %2059 = vpow2.f32 %v792_v38  ;;  %v783_v40 = vsub.f32 %v448_v8, %v767_v39 }
 0x43a   :  { %v794_v41 = vmul.f32 1.442695, %v783_v40 }
 0x43b   :  { %v770_v42 = vpop.xlane.xlu0 %769 }
 0x43c   :  { %2061 = vpow2.f32 %v794_v41  ;;  %v784_v43 = vsub.f32 %v524_v9, %v770_v42  ;;  %v773_v44 = vpop.xlane.xlu1 %772 }
 0x43d   :  { %v785_v45 = vsub.f32 %v600_v14, %v773_v44  ;;  %v2039_v44 = vld [vmem:[%s2457_s2 + $0x8] sm:$0xff]  }
 0x43e   :  { %v796_v46 = vmul.f32 1.442695, %v784_v43 }
 0x43f   :  { %v798_v47 = vmul.f32 1.442695, %v785_v45  ;;  %v776_v48 = vpop.xlane.xlu0 %775 }
 0x440   :  { %2063 = vpow2.f32 %v796_v46  ;;  %v786_v50 = vsub.f32 %v676_v13, %v776_v48  ;;  %v779_v51 = vpop.xlane.xlu1 %778 }
 0x441   :  { %2065 = vpow2.f32 %v798_v47  ;;  %v787_v52 = vsub.f32 %v752_v20, %v779_v51  ;;  %v2040_v47 = vld [vmem:[%s2457_s2] sm:$0xff]   ;;  %s2126_s2 = smov 24  }
 0x442   :  { %v800_v54 = vmul.f32 1.442695, %v786_v50 }
 0x443   :  { %v802_v55 = vmul.f32 1.442695, %v787_v52  ;;  %v845_v56 = vpop.permute.xlu0 %844 }
 0x444   :  { %2067 = vpow2.f32 %v800_v54  ;;  %v921_v57 = vpop.permute.xlu1 %920  ;;  %1935 = vmatpush3.msra.mxu1 %v845_v56 }
 0x445   :  { %v2060_v58 = vpop.eup %2059  ;;  %2069 = vpow2.f32 %v802_v55  ;;  %1940 = vmatpush3.msra.mxu0 %v921_v57  ;;  %1944 = vmatprep.subr.mxu1 %v2117_v15 }
 0x446   :  { %v810_v59 = vsel %vm149_vm2, %v2060_v58, 0.0  ;;  %1949 = vmatprep.subr.mxu0 %v2117_v15 }
 0x447   :  { %811 = vadd.xlane.f32.xlu0 %v810_v59  ;;  %v1149_v9 = vpop.permute.xlu0 %1148 }
 0x448   :  { %v997_v8 = vpop.permute.xlu1 %996 }
 0x449   :  { %v2062_v60 = vpop.eup %2061 }
 0x44a   :  { %v813_v61 = vsel %vm149_vm2, %v2062_v60, 0.0 }
 0x44b   :  { %814 = vadd.xlane.f32.xlu1 %v813_v61 }
 0x44c   :  { %v1073_v10 = vpop.permute.xlu1 %1072 }
 0x44d   :  { %v2064_v62 = vpop.eup %2063 }
 0x44e   :  { %v2066_v63 = vpop.eup %2065  ;;  %v816_v2 = vsel %vm149_vm2, %v2064_v62, 0.0 }
 0x44f   :  { %817 = vadd.xlane.f32.xlu0 %v816_v2  ;;  %v819_v3 = vsel %vm149_vm2, %v2066_v63, 0.0 }
 0x450   :  { %820 = vadd.xlane.f32.xlu1 %v819_v3  ;;  %v1225_v12 = vpop.permute.xlu1 %1224 }
 0x451   :  { %v2324_v4 = vpop.eup %2067 }
 0x452   :  { %v2326_v5 = vpop.eup %2069  ;;  %v822_v6 = vsel %vm149_vm2, %v2324_v4, 0.0 }
 0x453   :  { %823 = vadd.xlane.f32.xlu0 %v822_v6  ;;  %v825_v7 = vsel %vm149_vm2, %v2326_v5, 0.0 }
 0x454   :  { %826 = vadd.xlane.f32.xlu1 %v825_v7 }
 0x465   :  { %1376 = vrot.lane.b32.xlu1 %v2243_v53, %s2123_s8 }
 0x469   :  { %1300 = vrot.lane.b32.xlu0 %v2229_v49, %s2123_s8 }
 0x478   :  { %v806_v11 = vpop.xlane.xlu0 %805 }
 0x479   :  { %2071 = vrcp.f32 %v806_v11 }
 0x481   :  { %v809_v13 = vpop.xlane.xlu1 %808 }
 0x482   :  { %2073 = vrcp.f32 %v809_v13 }
 0x486   :  { %v2072_v14 = vpop.eup %2071 }
 0x487   :  { %v836_v16 = vmul.f32 %v2072_v14, %v2310_v32 }
 0x489   :  { %1937 = vmatmul.mubr.msk.f32.vlgmr.msra.gmra.mxu1 %vm149_vm2, %v836_v16 }
 0x48a   :  { %1945 = vmatpush3.msra.mxu1 %v997_v8  ;;  %1946 = vmatprep.mubr.msk.f32.mxu1 %vm2118_vm1, %v2117_v15 }
 0x48b   :  { %1954 = vmatprep.subr.mxu1 %v2117_v15 }
 0x48f   :  { %v2074_v49 = vpop.eup %2073 }
 0x490   :  { %v837_v53 = vmul.f32 %v2074_v49, %v2314_v34  ;;  %v1491_v49 = vsub.s32 4, %v2196_v24 }
 0x492   :  { %1942 = vmatmul.mubr.msk.f32.vlgmr.msra.gmra.mxu0 %vm149_vm2, %v837_v53  ;;  %v1492_v53 = vrot.slane %v2202_v26, %v1491_v49 }
 0x493   :  { %1950 = vmatpush3.msra.mxu0 %v1073_v10  ;;  %1951 = vmatprep.mubr.msk.f32.mxu0 %vm2118_vm1, %v2117_v15 }
 0x494   :  { %1959 = vmatprep.subr.mxu0 %v2117_v15 }
 0x4d0   :  { %v812_v17 = vpop.xlane.xlu0 %811 }
 0x4d1   :  { %2075 = vrcp.f32 %v812_v17 }
 0x4d4   :  { %v815_v18 = vpop.xlane.xlu1 %814 }
 0x4d5   :  { %2077 = vrcp.f32 %v815_v18 }
 0x4d8   :  { %v818_v19 = vpop.xlane.xlu0 %817 }
 0x4d9   :  { %2079 = vrcp.f32 %v818_v19  ;;  %v821_v20 = vpop.xlane.xlu1 %820 }
 0x4da   :  { %2081 = vrcp.f32 %v821_v20 }
 0x4dc   :  { %v824_v21 = vpop.xlane.xlu0 %823 }
 0x4dd   :  { %2083 = vrcp.f32 %v824_v21  ;;  %v827_v22 = vpop.xlane.xlu1 %826 }
 0x4de   :  { %v2076_v23 = vpop.eup %2075  ;;  %2085 = vrcp.f32 %v827_v22 }
 0x4df   :  { %v838_v25 = vmul.f32 %v2076_v23, %v2060_v58 }
 0x4e0   :  { %v1301_v33 = vpop.permute.xlu0 %1300 }
 0x4e1   :  { %1947 = vmatmul.mubr.msk.f32.vlgmr.msra.gmra.mxu1 %vm149_vm2, %v838_v25  ;;  %v1377_v35 = vpop.permute.xlu1 %1376 }
 0x4e2   :  { %v2078_v27 = vpop.eup %2077  ;;  %1955 = vmatpush3.msra.mxu1 %v1149_v9  ;;  %1956 = vmatprep.mubr.msk.f32.mxu1 %vm2118_vm1, %v2117_v15 }
 0x4e3   :  { %v839_v28 = vmul.f32 %v2078_v27, %v2062_v60  ;;  %1964 = vmatprep.subr.mxu1 %v2117_v15 }
 0x4e5   :  { %1952 = vmatmul.mubr.msk.f32.vlgmr.msra.gmra.mxu0 %vm149_vm2, %v839_v28 }
 0x4e6   :  { %v2080_v29 = vpop.eup %2079  ;;  %1960 = vmatpush3.msra.mxu0 %v1225_v12  ;;  %1961 = vmatprep.mubr.msk.f32.mxu0 %vm2118_vm1, %v2117_v15 }
 0x4e7   :  { %v2082_v30 = vpop.eup %2081  ;;  %1969 = vmatprep.subr.mxu0 %v2117_v15  ;;  %v840_v31 = vmul.f32 %v2080_v29, %v2064_v62 }
 0x4e8   :  { %v841_v32 = vmul.f32 %v2082_v30, %v2066_v63 }
 0x4e9   :  { %1957 = vmatmul.mubr.msk.f32.vlgmr.msra.gmra.mxu1 %vm149_vm2, %v840_v31 }
 0x4ea   :  { %v2084_v34 = vpop.eup %2083  ;;  %1962 = vmatmul.mubr.msk.f32.vlgmr.msra.gmra.mxu0 %vm149_vm2, %v841_v32  ;;  %1965 = vmatpush3.msra.mxu1 %v1301_v33 }
 0x4eb   :  { %v2086_v36 = vpop.eup %2085  ;;  %1970 = vmatpush3.msra.mxu0 %v1377_v35  ;;  %1966 = vmatprep.mubr.msk.f32.mxu1 %vm2118_vm1, %v2117_v15  ;;  %v842_v37 = vmul.f32 %v2084_v34, %v2324_v4 }
 0x4ec   :  { %1971 = vmatprep.mubr.msk.f32.mxu0 %vm2118_vm1, %v2117_v15  ;;  %v843_v38 = vmul.f32 %v2086_v36, %v2326_v5  ;;  %1974 = vmatprep.subr.bf16.mxu0 %v2117_v15 }
 0x4ed   :  { %1967 = vmatmul.mubr.msk.f32.vlgmr.msra.gmra.mxu1 %vm149_vm2, %v842_v37  ;;  %1990 = vmatprep.subr.bf16.mxu1 %v2117_v15  ;;  %v2041_v37 = vld [vmem:[%s2458_s3 + $0x8] sm:$0xff]  }
 0x4ee   :  { %1972 = vmatmul.mubr.msk.f32.vlgmr.msra.gmra.mxu0 %vm149_vm2, %v843_v38  ;;  %2006 = vmatprep.mubr.msk.bf16.mxu1 %vm2118_vm1, %v2117_v15  ;;  %v2042_v38 = vld [vmem:[%s2458_s3] sm:$0xff]  }
 0x4ef   :  { %1978 = vmatprep.mubr.msk.bf16.mxu0 %vm2118_vm1, %v2117_v15  ;;  %1975 = vmatpush3.bf16.msra.mxu0 %v2039_v44 }
 0x4f0   :  { %1976 = vmatprep.subr.bf16.mxu0 %v2117_v15 }
 0x4f3   :  { %1977 = vmatpush3.bf16.msra.mxu0 %v2040_v47 }
 0x4f4   :  { %1982 = vmatprep.subr.bf16.mxu0 %v2117_v15 }
 0x549   :  { %v916_v39 = vpop.f32.mrf.mxu1 }
 0x54b   :  { %v1938_v40 = vpop.f32.mrf.mxu1 }
 0x552   :  { %v992_v41 = vpop.f32.mrf.mxu0 }
 0x554   :  { %v1943_v42 = vpop.f32.mrf.mxu0 }
 0x5a1   :  { %v1068_v43 = vpop.f32.mrf.mxu1 }
 0x5a3   :  { %v1948_v45 = vpop.f32.mrf.mxu1 }
 0x5a5   :  { %v1144_v46 = vpop.f32.mrf.mxu0 }
 0x5a6   :  { %v2022_v48 = vpack.i.bf16 %v1144_v46, %v1068_v43  ;;  %v1579_v46 = vsub.s32 2, %v2196_v24 }
 0x5a7   :  { %v1953_v50 = vpop.f32.mrf.mxu0 }
 0x5a8   :  { %2023 = vrot.lane.b32.xlu0 %v2022_v48, %s2124_s13  ;;  %v1580_v50 = vrot.slane %v2202_v26, %v1579_v46 }
 0x5a9   :  { %v1220_v51 = vpop.f32.mrf.mxu1 }
 0x5aa   :  { %v1296_v52 = vpop.f32.mrf.mxu0 }
 0x5ab   :  { %v2027_v54 = vpack.i.bf16 %v1296_v52, %v1220_v51  ;;  %v1958_v55 = vpop.f32.mrf.mxu1  ;;  %v1585_v51 = vsub.s32 3, %v2196_v24 }
 0x5ac   :  { %v1963_v56 = vpop.f32.mrf.mxu0 }
 0x5ad   :  { %2028 = vrot.lane.b32.xlu1 %v2027_v54, %s2125_s14  ;;  %v1372_v57 = vpop.f32.mrf.mxu1  ;;  %v1586_v56 = vrot.slane %v2202_v26, %v1585_v51 }
 0x5ae   :  { %v1448_v58 = vpop.f32.mrf.mxu0 }
 0x5af   :  { %v2032_v59 = vpack.i.bf16 %v1448_v58, %v1372_v57  ;;  %v1968_v60 = vpop.f32.mrf.mxu1 }
 0x5b0   :  { %v1973_v61 = vpop.f32.mrf.mxu0 }
 0x5b1   :  { %2033 = vrot.lane.b32.xlu0 %v2032_v59, %s2126_s2  ;;  %v2044_v61 = vld [vmem:[%s2459_s4 + $0x30] sm:$0xff]  }
 0x61a   :  { %v2024_v62 = vpop.permute.xlu0 %2023 }
 0x61b   :  { %v2026_v2 = vunpack.i.h.bf16 %v2024_v62  ;;  %v2025_v3 = vunpack.i.l.bf16 %v2024_v62  ;;  %v2045_v62 = vld [vmem:[%s2459_s4 + $0x28] sm:$0xff]  }
 0x61d   :  { %v1477_v7 = vsel %vm149_vm2, %v992_v41, %v2026_v2  ;;  %v1476_v8 = vsel %vm149_vm2, %v916_v39, %v2025_v3  ;;  %v2043_v39 = vld [vmem:[%s2459_s4 + $0x38] sm:$0xff]   ;;  %v2048_v3 = vld [vmem:[%s2459_s4 + $0x10] sm:$0xff]  }
 0x61e   :  { %1991 = vmatpush3.bf16.msra.mxu1 %v2043_v39  ;;  %v2047_v2 = vld [vmem:[%s2459_s4 + $0x18] sm:$0xff]  }
 0x61f   :  { %v2029_v63 = vpop.permute.xlu1 %2028  ;;  %1992 = vmatprep.subr.bf16.mxu1 %v2117_v15 }
 0x620   :  { %v2031_v4 = vunpack.i.h.bf16 %v2029_v63  ;;  %v2030_v5 = vunpack.i.l.bf16 %v2029_v63  ;;  %v2046_v63 = vld [vmem:[%s2459_s4 + $0x20] sm:$0xff]  }
 0x622   :  { %v1480_v11 = vsel %vm1478_vm3, %v1477_v7, %v2031_v4  ;;  %v1479_v12 = vsel %vm1478_vm3, %v1476_v8, %v2030_v5  ;;  %1993 = vmatpush3.bf16.msra.mxu1 %v2044_v61  ;;  %v2049_v4 = vld [vmem:[%s2459_s4 + $0x8] sm:$0xff]   ;;  %v2050_v5 = vld [vmem:[%s2459_s4] sm:$0xff]   ;;  %s2127_s4 = smov [#allocation2]  }
 0x623   :  { %v2034_v6 = vpop.permute.xlu0 %2033  ;;  %1994 = vmatprep.subr.bf16.mxu1 %v2117_v15  ;;  %s1784_s7 = sshll.u32 %s2127_s4, 4  ;;  %s1785_s7 = int_to_ptr.vmem [resolvable:$true] %s1784_s7 }
 0x624   :  { %v2036_v9 = vunpack.i.h.bf16 %v2034_v6  ;;  %v2035_v10 = vunpack.i.l.bf16 %v2034_v6  ;;  %v1596_v6 = vsub.s32 7, %v2196_v24  ;;  %s2095_s8 = scalar_lea.vmem %s1785_s7, 256  ;;  %p2100_p1 = scmp.lt.s32.totalorder %s1785_s7, %s1785_s7 }
 0x625   :  { %p2096_p0 = scmp.ne.s32.totalorder %s1785_s7, %s2095_s8  ;;  %p2101_p2 = scmp.lt.s32.totalorder %s2095_s8, %s2095_s8 }
 0x626   :  { %v1483_v13 = vsel %vm1481_vm4, %v1480_v11, %v2036_v9  ;;  %v1482_v14 = vsel %vm1481_vm4, %v1479_v12, %v2035_v10  ;;  %1995 = vmatpush3.bf16.msra.mxu1 %v2045_v62  ;;  %v1597_v7 = vrot.slane %v2202_v26, %v1596_v6 }
 0x627   :  { %v1484_v16 = vpack.c.bf16 %v1483_v13, %v1482_v14  ;;  %1996 = vmatprep.subr.bf16.mxu1 %v2117_v15  ;;  %p2102_p3 = por %p2101_p2, %p2100_p1 }
 0x629   :  { %1979 = vmatmul.mubr.msk.bf16.vlgmr.msra.gmra.mxu0 %vm28_vm0, %v1484_v16  ;;  %p2103_p4 = pnand %p2102_p3, %p2096_p0 }
 0x62a   :  { %1986 = vmatprep.mubr.msk.bf16.mxu0 %vm2118_vm1, %v2117_v15  ;;  %1983 = vmatpush3.bf16.msra.mxu0 %v2041_v37 }
 0x62b   :  { %1984 = vmatprep.subr.bf16.mxu0 %v2117_v15  ;;  %1997 = vmatpush3.bf16.msra.mxu1 %v2046_v63 }
 0x62c   :  { %1998 = vmatprep.subr.bf16.mxu1 %v2117_v15 }
 0x62e   :  { %1985 = vmatpush3.bf16.msra.mxu0 %v2042_v38 }
 0x62f   :  { %1999 = vmatpush3.bf16.msra.mxu1 %v2047_v2 }
 0x630   :  { %2000 = vmatprep.subr.bf16.mxu1 %v2117_v15 }
 0x633   :  { %2001 = vmatpush3.bf16.msra.mxu1 %v2048_v3 }
 0x634   :  { %2002 = vmatprep.subr.bf16.mxu1 %v2117_v15 }
 0x637   :  { %2003 = vmatpush3.bf16.msra.mxu1 %v2049_v4 }
 0x638   :  { %2004 = vmatprep.subr.bf16.mxu1 %v2117_v15 }
 0x63b   :  { %2005 = vmatpush3.bf16.msra.mxu1 %v2050_v5 }
 0x6e9   :  { %v1542_v17 = vpop.f32.mrf.mxu0 }
 0x6ea   :  { %v1543_v18 = vadd.f32 %v1542_v17, %v1492_v53 }
 0x6eb   :  { %v1980_v19 = vpop.f32.mrf.mxu0 }
 0x6ec   :  { %v2387_v20 = vadd.f32 %v1543_v18, %v2167_v0 }
 0x6ed   :  { %v1545_v21 = vpop.f32.mrf.mxu0 }
 0x6ee   :  { %v1546_v22 = vadd.f32 %v1545_v21, %v1492_v53  ;;  %v1551_v23 = vsel %vm28_vm0, %v2387_v20, 0.0 }
 0x6ef   :  { %1552 = vadd.xlane.f32.xlu1 %v1551_v23  ;;  %v1981_v25 = vpop.f32.mrf.mxu0 }
 0x6f0   :  { %v2392_v27 = vadd.f32 %v1546_v22, %v2172_v1  ;;  %v1684_v25 = vsub.s32 5, %v2196_v24 }
 0x6f2   :  { %v1554_v28 = vsel %vm28_vm0, %v2392_v27, 0.0 }
 0x6f3   :  { %1555 = vadd.xlane.f32.xlu0 %v1554_v28  ;;  %v1685_v28 = vrot.slane %v2202_v26, %v1684_v25 }
 0x778   :  { %v1553_v29 = vpop.xlane.xlu1 %1552 }
 0x779   :  { %v1557_v30 = vmul.f32 0.03125, %v1553_v29 }
 0x77b   :  { %v1559_v31 = vsub.f32 %v2387_v20, %v1557_v30 }
 0x77c   :  { %v1556_v0 = vpop.xlane.xlu0 %1555 }
 0x77d   :  { %v1558_v32 = vmul.f32 0.03125, %v1556_v0  ;;  %v1561_v33 = vmul.f32 %v1559_v31, %v1559_v31 }
 0x77f   :  { %v1560_v34 = vsub.f32 %v2392_v27, %v1558_v32  ;;  %v1563_v35 = vsel %vm28_vm0, %v1561_v33, 0.0 }
 0x780   :  { %1564 = vadd.xlane.f32.xlu0 %v1563_v35 }
 0x781   :  { %v1562_v36 = vmul.f32 %v1560_v34, %v1560_v34 }
 0x783   :  { %v1566_v1 = vsel %vm28_vm0, %v1562_v36, 0.0 }
 0x784   :  { %1567 = vadd.xlane.f32.xlu0 %v1566_v1 }
 0x809   :  { %v1565_v40 = vpop.xlane.xlu0 %1564 }
 0x80a   :  { %v1569_v41 = vmul.f32 0.03125, %v1565_v40 }
 0x80c   :  { %v1571_v42 = vadd.f32 1e-05, %v1569_v41 }
 0x80d   :  { %v1568_v43 = vpop.xlane.xlu0 %1567 }
 0x80e   :  { %2087 = vrsqrt.f32 %v1571_v42  ;;  %v1570_v44 = vmul.f32 0.03125, %v1568_v43 }
 0x810   :  { %v1572_v45 = vadd.f32 1e-05, %v1570_v44 }
 0x812   :  { %2089 = vrsqrt.f32 %v1572_v45 }
 0x81b   :  { %v2088_v47 = vpop.eup %2087 }
 0x81c   :  { %v1575_v48 = vmul.f32 %v2088_v47, %v1559_v31 }
 0x81e   :  { %v1581_v55 = vmul.f32 %v1580_v50, %v1575_v48 }
 0x81f   :  { %v2090_v52 = vpop.eup %2089 }
 0x820   :  { %v1576_v54 = vmul.f32 %v2090_v52, %v1560_v34  ;;  %v1587_v58 = vadd.f32 %v1586_v56, %v1581_v55 }
 0x822   :  { %v1582_v57 = vmul.f32 %v1580_v50, %v1576_v54 }
 0x824   :  { %v1588_v59 = vadd.f32 %v1586_v56, %v1582_v57 }
 0x826   :  { %v1589_v60 = vpack.c.bf16 %v1588_v59, %v1587_v58 }
 0x828   :  { %1987 = vmatmul.mubr.msk.bf16.vlgmr.msra.gmra.mxu0 %vm28_vm0, %v1589_v60 }
 0x8e8   :  { %v1647_v8 = vpop.f32.mrf.mxu0 }
 0x8e9   :  { %v1648_v9 = vadd.f32 %v1647_v8, %v1597_v7 }
 0x8ea   :  { %v1988_v10 = vpop.f32.mrf.mxu0 }
 0x8eb   :  { %v1657_v11 = vmul.f32 0.70710677, %v1648_v9  ;;  %v1654_v17 = vmul.f32 0.5, %v1648_v9 }
 0x8ec   :  { %v1650_v12 = vpop.f32.mrf.mxu0 }
 0x8ed   :  { %2091 = verf.f32 %v1657_v11  ;;  %v1651_v13 = vadd.f32 %v1650_v12, %v1597_v7 }
 0x8ee   :  { %v1989_v14 = vpop.f32.mrf.mxu0 }
 0x8ef   :  { %v1658_v16 = vmul.f32 0.70710677, %v1651_v13  ;;  %v1655_v18 = vmul.f32 0.5, %v1651_v13 }
 0x8f1   :  { %2093 = verf.f32 %v1658_v16 }
 0x8fa   :  { %v2092_v15 = vpop.eup %2091 }
 0x8fb   :  { %v1661_v49 = vadd.f32 1.0, %v2092_v15 }
 0x8fd   :  { %v1663_v21 = vmul.f32 %v1661_v49, %v1654_v17 }
 0x8fe   :  { %v2094_v53 = vpop.eup %2093 }
 0x8ff   :  { %v1662_v19 = vadd.f32 1.0, %v2094_v53 }
 0x901   :  { %v1664_v22 = vmul.f32 %v1662_v19, %v1655_v18 }
 0x903   :  { %v1665_v23 = vpack.c.bf16 %v1664_v22, %v1663_v21 }
 0x905   :  { %2007 = vmatmul.mubr.bf16.vlgmr.msra.gmra.mxu1 %v1665_v23 }
 0x9c5   :  { %v1768_v29 = vpop.f32.mrf.mxu1 }
 0x9c6   :  { %v1769_v30 = vadd.f32 %v1768_v29, %v1685_v28 }
 0x9c7   :  { %v2008_v31 = vpop.f32.mrf.mxu1 }
 0x9c8   :  { %v1775_v0 = vadd.f32 %v1769_v30, %v2387_v20 }
 0x9c9   :  { %v1771_v32 = vpop.f32.mrf.mxu1 }
 0x9ca   :  { %1777 = vst.msk [vmem:[#allocation2] sm:$0xff] %vm28_vm0, %v1775_v0  ;;  %v1772_v33 = vadd.f32 %v1771_v32, %v1685_v28 }
 0x9cb   :  { %v2009_v34 = vpop.f32.mrf.mxu1 }
 0x9cc   :  { %v1776_v35 = vadd.f32 %v1772_v33, %v2392_v27 }
 0x9ce   :  { %1778 = vst.msk [vmem:[#allocation2 + $0x8] sm:$0xff] %vm28_vm0, %v1776_v35 }
 0x9cf   :  { %2106 = shalt.err (!%p2103_p4)
}
 0x9d0   :  { %s2128_s9 = smov 128  }
 0x9d1   :  { %1790 = dma.vmem_to_hbm [thread:$0]  %s1785_s7, 256, %s2461_s6, [#allocation3], %s2128_s9, %s2128_s9, %s2124_s13  }
 0x9d2   :  { %2115 = dma.done.wait [#allocation3], 256  }
 0x9d3   :  { %2116 = vsyncadd [#allocation3], 4294967040 }
 0x9d4   :  { %1794 = vsyncpa [#allocation3], 1 }

</bundles_post_ra>
